<compile_context>
chip_gen: v5e
topology: v5e:2x2
jax: 0.10.0
libtpu: 0.0.40
codegen_flags: <defaults>
</compile_context>

<pallas_src>
import functools
import math

import jax
import jax.numpy as jnp
from jax.experimental import pallas as pl
from jax.experimental.pallas import tpu as pltpu


def _round_up(x, m):
    return ((x + m - 1) // m) * m


def _divisor_block(dim, align, target):
    """Largest block size that divides `dim`, is a multiple of `align`, and is
    <= target.  Allows a modest overshoot (<= 2*target) when only very small
    divisors exist below the target (avoids tiny tiles on awkward dims)."""
    assert dim > 0 and dim % align == 0
    m = dim // align
    divs = [d * align for d in range(1, m + 1) if m % d == 0]
    le = [d for d in divs if d <= target]
    best = max(le) if le else align
    if best * 2 <= target:
        over = [d for d in divs if target < d <= 2 * target]
        if over:
            best = min(over)
    return best


def _device_kind():
    try:
        return jax.devices()[0].device_kind.lower()
    except Exception:
        return ""


def _pick_tiles(Mp, Np, Kp):
    """Per-generation tile targets; tiles always divide the (aligned) dims."""
    kind = _device_kind()
    if "v6" in kind:
        # 128 MiB VMEM, ~1.4 TB/s HBM: widest output tiles to raise intensity.
        tm_t, tn_t, tk_t = 512, 1024, 512
    elif "v7" in kind:
        # 256x256 MXU, 3.2 TB/s HBM, 32 MiB scoped / 64 MiB physical VMEM.
        tm_t, tn_t, tk_t = 512, 512, 512
    elif "v5" in kind:
        # Lowest HBM BW -> keep arithmetic intensity high; 128 MiB VMEM is ample.
        tm_t, tn_t, tk_t = 512, 512, 512
    else:
        tm_t, tn_t, tk_t = 256, 512, 512

    tm = Mp if Mp % 8 != 0 else _divisor_block(Mp, 8, tm_t)
    tn = _divisor_block(Np, 128, tn_t)
    tk = Kp if Kp % 128 != 0 else _divisor_block(Kp, 128, tk_t)

    # v7x has 2 TensorCores sharing the grid's "parallel" axes: make sure the
    # (i, j) grid has >= 2 blocks, preferring a lane-dense split along N.
    if "v7" in kind and (Mp // tm) * (Np // tn) < 2:
        if Np // 128 >= 2:
            tn = _divisor_block(Np, 128, max(128, (Np // 2) // 128 * 128))
        elif Mp >= 16 and Mp % 16 == 0:
            tm = _divisor_block(Mp, 8, Mp // 2)
    return tm, tn, tk


def _dense_kernel(x_ref, w_ref, b_ref, o_ref, *, compute_dtype):
    # x: (tm, tk), w: (tk, tn) [pre-transposed], b: (1, tn), o: (tm, tn) f32.
    k = pl.program_id(2)

    @pl.when(k == 0)
    def _():
        # Initialise the resident output block with the bias: bias is added
        # exactly once per output tile, no separate epilogue pass needed.
        o_ref[...] = jnp.broadcast_to(b_ref[...], o_ref.shape)

    x = x_ref[...]
    w = w_ref[...]
    if jnp.dtype(compute_dtype) != jnp.dtype(jnp.float32):
        # Opt-in bf16 MXU path (numerics change -> off by default).
        x = x.astype(compute_dtype)
        w = w.astype(compute_dtype)

    # Accumulate directly into the f32 output block; its index_map ignores k so
    # the block stays resident in VMEM across the whole K loop.
    o_ref[...] += jnp.dot(x, w, preferred_element_type=jnp.float32)


# Only force 128-alignment on K (enabling a K split) when K is large enough
# that keeping the full K extent per block would pressure VMEM.
_K_SPLIT_MIN = 2048


def prepare_dense_params(weight, bias=None):
    """One-time conversion of PyTorch nn.Linear-layout params into the kernel's
    weight-stationary layout: W (N, K) -> W^T (Kp, Np), bias -> (1, Np), both
    zero-padded to lane alignment.  Call once at init, NOT per forward call."""
    weight = jnp.asarray(weight, jnp.float32)
    N, K = weight.shape
    Np = _round_up(N, 128)
    Kp = _round_up(K, 128) if K > _K_SPLIT_MIN else K

    w_t = weight.T                                    # (K, N)
    if (Kp, Np) != (K, N):
        w_t = jnp.pad(w_t, ((0, Kp - K), (0, Np - N)))
    if bias is None:
        b2d = jnp.zeros((1, Np), jnp.float32)
    else:
        b2d = jnp.asarray(bias, jnp.float32).reshape(1, N)
        if Np != N:
            b2d = jnp.pad(b2d, ((0, 0), (0, Np - N)))
    return w_t, b2d, N, K


def dense_apply(x, params, precision="float32"):
    """y = x @ W.T + b using params from prepare_dense_params()."""
    w_t, b2d, N, K_orig = params
    Kp, Np = w_t.shape

    orig_shape = x.shape
    K = orig_shape[-1]
    assert K == K_orig, f"in_features mismatch: {K} vs {K_orig}"

    x2d = jnp.asarray(x, jnp.float32).reshape(-1, K)
    M = x2d.shape[0]

    # Minimal alignment padding of the activation (only when strictly needed).
    if K != Kp:                                  # K was 128-aligned at prepare time
        x2d = jnp.pad(x2d, ((0, 0), (0, Kp - K)))
    Mp = M
    if M % 8 != 0 and M > 512:                   # large, misaligned M: pad to sublane
        Mp = _round_up(M, 8)
        x2d = jnp.pad(x2d, ((0, Mp - M), (0, 0)))

    tm, tn, tk = _pick_tiles(Mp, Np, Kp)
    grid = (Mp // tm, Np // tn, Kp // tk)

    compute_dtype = jnp.bfloat16 if precision == "bfloat16" else jnp.float32

    # Actual VMEM footprint: double-buffered x / W^T tiles + output block
    # (2x for safety) + bias, with ~30% headroom.  Stays far under v7x's 64 MiB.
    footprint = 4 * (2 * (tm * tk + tk * tn) + 2 * tm * tn + 2 * tn)
    vmem_limit = int(min(64 * 1024 * 1024,
                         max(int(footprint * 1.3), 16 * 1024 * 1024)))

    out = pl.pallas_call(
        functools.partial(_dense_kernel, compute_dtype=compute_dtype),
        out_shape=jax.ShapeDtypeStruct((Mp, Np), jnp.float32),
        grid_spec=pltpu.PrefetchScalarGridSpec(
            num_scalar_prefetch=0,
            grid=grid,
            in_specs=[
                pl.BlockSpec((tm, tk), lambda i, j, k: (i, k)),   # x tile
                pl.BlockSpec((tk, tn), lambda i, j, k: (k, j)),   # W^T tile
                pl.BlockSpec((1, tn), lambda i, j, k: (0, j)),    # bias (re-fetched
                                                                   # only on j change)
            ],
            out_specs=pl.BlockSpec((tm, tn), lambda i, j, k: (i, j)),
        ),
        compiler_params=pltpu.CompilerParams(
            dimension_semantics=("parallel", "parallel", "arbitrary"),
            vmem_limit_bytes=vmem_limit,
        ),
    )(x2d, w_t, b2d)

    out = out[:M, :N]
    return out.reshape(*orig_shape[:-1], N)


def dense(x, weight, bias=None, precision="float32"):
    """Convenience wrapper matching torch.nn.functional.linear(x, weight, bias).
    Prefer prepare_dense_params() + dense_apply() to amortise the weight prep."""
    return dense_apply(x, prepare_dense_params(weight, bias), precision)


def init_dense_params(key, in_features, out_features):
    """Deterministic re-implementation of Dense.reset_parameters()."""
    kw, kb = jax.random.split(key)
    # kaiming_uniform_(weight, a=sqrt(5)) -> bound = sqrt(1 / fan_in)
    fan_in = in_features
    w_bound = math.sqrt(1.0 / fan_in)
    weight = jax.random.uniform(
        kw, (out_features, in_features), jnp.float32, -w_bound, w_bound
    )
    b_bound = 1.0 / math.sqrt(fan_in)
    bias = jax.random.uniform(kb, (out_features,), jnp.float32, -b_bound, b_bound)
    return weight, bias


if __name__ == "__main__":
    key = jax.random.PRNGKey(0)
    k_x, k_x3, k_p = jax.random.split(key, 3)

    batch = 8
    in_features = 32
    out_features = 64

    x = jax.random.normal(k_x, (batch, in_features), jnp.float32)
    weight, bias = init_dense_params(k_p, in_features, out_features)

    # Parameter prep (transpose + lane padding) done ONCE, outside the call path.
    params = prepare_dense_params(weight, bias)

    # 2-D path (torch.addmm branch of Linear_Function).
    y = dense_apply(x, params)
    jax.block_until_ready(y)
    y_ref = x @ weight.T + bias
    assert y.shape == (batch, out_features)
    assert jnp.allclose(y, y_ref, atol=1e-5, rtol=1e-5)

    # N-D path (matmul + bias broadcast branch of Linear_Function).
    x3 = jax.random.normal(k_x3, (2, batch, in_features), jnp.float32)
    y3 = dense_apply(x3, params)
    jax.block_until_ready(y3)
    y3_ref = x3 @ weight.T + bias
    assert y3.shape == (2, batch, out_features)
    assert jnp.allclose(y3, y3_ref, atol=1e-5, rtol=1e-5)

    # Convenience wrapper + opt-in bf16 MXU path (looser tolerance by design).
    y_bf16 = dense(x, weight, bias, precision="bfloat16")
    jax.block_until_ready(y_bf16)
    assert y_bf16.shape == (batch, out_features)
    assert jnp.allclose(y_bf16, y_ref, atol=5e-2, rtol=5e-2)

    print("KERNEL_OK")
</pallas_src>

<mosaic_0001>
module attributes {stable_mosaic.version = 11 : i64} {
  func.func @_dense_kernel(%arg0: i32, %arg1: i32, %arg2: i32, %arg3: memref<8x32xf32, #tpu.memory_space<vmem>>, %arg4: memref<32x128xf32, #tpu.memory_space<vmem>>, %arg5: memref<1x128xf32, #tpu.memory_space<vmem>>, %arg6: memref<8x128xf32, #tpu.memory_space<vmem>>) attributes {dimension_semantics = [#tpu.dimension_semantics<parallel>, #tpu.dimension_semantics<parallel>, #tpu.dimension_semantics<arbitrary>], iteration_bounds = array<i64: 1, 1, 1>, scalar_prefetch = 0 : i64, scratch_operands = 0 : i64, tpu.core_type = #tpu.core_type<tc>, window_params = [{transform_indices = @transform_0, window_bounds = array<i64: 8, 32>}, {transform_indices = @transform_1, window_bounds = array<i64: 32, 128>}, {transform_indices = @transform_2, window_bounds = array<i64: 1, 128>}, {transform_indices = @transform_3, window_bounds = array<i64: 8, 128>}]} {
    %c0_i32 = arith.constant 0 : i32
    %0 = arith.cmpi eq, %arg2, %c0_i32 : i32
    %1 = arith.extui %0 : i1 to i32
    %c0_i32_0 = arith.constant 0 : i32
    %2 = arith.cmpi ne, %1, %c0_i32_0 : i32
    scf.if %2 {
      %c0_8 = arith.constant 0 : index
      %c0_9 = arith.constant 0 : index
      %9 = vector.load %arg5[%c0_8, %c0_9] : memref<1x128xf32, #tpu.memory_space<vmem>>, vector<1x128xf32>
      %10 = vector.shape_cast %9 : vector<1x128xf32> to vector<1x128xf32>
      %11 = vector.broadcast %10 : vector<1x128xf32> to vector<8x128xf32>
      %c0_10 = arith.constant 0 : index
      %c0_11 = arith.constant 0 : index
      %12 = vector.load %arg6[%c0_10, %c0_11] : memref<8x128xf32, #tpu.memory_space<vmem>>, vector<8x128xf32>
      tpu.vector_store %arg6[%c0_10, %c0_11], %11 {strides = array<i32>} : memref<8x128xf32, #tpu.memory_space<vmem>>, vector<8x128xf32>,
    } else {
    }
    %c0 = arith.constant 0 : index
    %c0_1 = arith.constant 0 : index
    %3 = vector.load %arg3[%c0, %c0_1] : memref<8x32xf32, #tpu.memory_space<vmem>>, vector<8x32xf32>
    %c0_2 = arith.constant 0 : index
    %c0_3 = arith.constant 0 : index
    %4 = vector.load %arg4[%c0_2, %c0_3] : memref<32x128xf32, #tpu.memory_space<vmem>>, vector<32x128xf32>
    %c0_4 = arith.constant 0 : index
    %c0_5 = arith.constant 0 : index
    %5 = vector.load %arg6[%c0_4, %c0_5] : memref<8x128xf32, #tpu.memory_space<vmem>>, vector<8x128xf32>
    %cst = arith.constant dense<0.000000e+00> : vector<8x128xf32>
    %6 = tpu.matmul %3, %4, %cst {dimension_numbers = #tpu.dot_dimension_numbers<[1], [0], [0], [1], [0, 0, 1, 1], [], []>} : vector<8x32xf32>, vector<32x128xf32>, vector<8x128xf32> -> vector<8x128xf32>
    %7 = arith.addf %5, %6 : vector<8x128xf32>
    %c0_6 = arith.constant 0 : index
    %c0_7 = arith.constant 0 : index
    %8 = vector.load %arg6[%c0_6, %c0_7] : memref<8x128xf32, #tpu.memory_space<vmem>>, vector<8x128xf32>
    tpu.vector_store %arg6[%c0_6, %c0_7], %7 {strides = array<i32>} : memref<8x128xf32, #tpu.memory_space<vmem>>, vector<8x128xf32>,
    return
  }
  func.func @transform_0(%arg0: i32, %arg1: i32, %arg2: i32) -> (i32, i32) {
    %c0_i32 = arith.constant 0 : i32
    return %arg0, %arg2 : i32, i32
  }
  func.func @transform_1(%arg0: i32, %arg1: i32, %arg2: i32) -> (i32, i32) {
    %c0_i32 = arith.constant 0 : i32
    return %arg2, %arg1 : i32, i32
  }
  func.func @transform_2(%arg0: i32, %arg1: i32, %arg2: i32) -> (i32, i32) {
    %c0_i32 = arith.constant 0 : i32
    %c0_i32_0 = arith.constant 0 : i32
    return %c0_i32, %arg1 : i32, i32
  }
  func.func @transform_3(%arg0: i32, %arg1: i32, %arg2: i32) -> (i32, i32) {
    %c0_i32 = arith.constant 0 : i32
    return %arg0, %arg1 : i32, i32
  }
}

</mosaic_0001>

<bundles_post_ra>
// kernel: tpu_custom_call.1
= control target key start
LH: loop header
LB: loop body
LE: loop exit
PB: predicated region body
PF: predicated region fallthrough
CT: control target
= control target key end

     0   :  { %8 = vsyncpa [#allocation3], 0  ;;  %s226_s0 = inlined_call_operand.hbm [shape: f32[8,32], index: 0, kind: input, shape index: {}]   ;;  %s227_s1 = inlined_call_operand.hbm [shape: f32[32,128], index: 1, kind: input, shape index: {}]   ;;  %s228_s2 = inlined_call_operand.vmem [shape: f32[1,128], index: 2, kind: input, shape index: {}]   ;;  %s229_s3 = inlined_call_operand.hbm [shape: f32[8,128], index: 3, kind: output, shape index: {}]  }
   0x1   :  { %9 = vsyncpa [#allocation6], 0 }
   0x2   :  { %10 = vsyncpa [#allocation4], 0  ;;  %s16_s14 = sshll.u32 %s226_s0, 4  ;;  %s189_s15 = smov [#allocation2]   ;;  %s17_s14 = int_to_ptr.hbm [resolvable:$true] %s16_s14 }
   0x3   :  { %s18_s16 = sshll.u32 %s189_s15, 4  ;;  %s26_s19 = sshll.u32 %s227_s1, 4  ;;  %s19_s16 = int_to_ptr.vmem [resolvable:$true] %s18_s16  ;;  %s27_s19 = int_to_ptr.hbm [resolvable:$true] %s26_s19 }
   0x4   :  { %21 = dma.hbm_to_vmem [thread:$0]  %s17_s14, 128, %s19_s16, [#allocation3]  }
   0x5   :  { %s190_s20 = smov [#allocation5]   ;;  %s191_s22 = smov 128  }
   0x6   :  { %s28_s21 = sshll.u32 %s190_s20, 4  ;;  %s192_s23 = smov 8   ;;  %s29_s21 = int_to_ptr.vmem [resolvable:$true] %s28_s21 }
   0x7   :  { %34 = dma.hbm_to_vmem [thread:$0]  %s27_s19, 512, %s29_s21, [#allocation6], %s191_s22, %s191_s22, %s192_s23  }
   0x8   :  { %183 = dma.done.wait [#allocation3], 128  }
   0x9   :  { %184 = vsyncadd [#allocation3], 4294967168 }
   0xa   :  { %185 = dma.done.wait [#allocation6], 512  }
   0xb   :  { %186 = vsyncadd [#allocation6], 4294966784  ;;  %v58_v0 = vld [vmem:[#allocation5 + $0x18] sm:$0xff]  ;;  %v57_v1 = vld [vmem:[#allocation5 + $0x10] sm:$0xff]  ;;  %vm60_vm0 = vcmask 261120   ;;  %s193_s24 = smov [#allocation7]  }
   0xc   :  { %76 = vmatpush.msra.mxu0 %v58_v0  ;;  %v56_v2 = vld [vmem:[#allocation5 + $0x8] sm:$0xff]  ;;  %v55_v3 = vld [vmem:[#allocation5] sm:$0xff]  ;;  %v54_v4 = vld [vmem:[#allocation2] sm:$0xff]  ;;  %s91_s25 = sshll.u32 %s193_s24, 4  ;;  %s93_s28 = sshll.u32 %s229_s3, 4  ;;  %s92_s25 = int_to_ptr.vmem [resolvable:$true] %s91_s25  ;;  %s94_s28 = int_to_ptr.hbm [resolvable:$true] %s93_s28 }
   0xd   :  { %v110_v5 = vld [vmem:[%s228_s2] ss:$0 sm:$0xff] }
   0xe   :  { %77 = vmatpush.msra.mxu0 %v57_v1 }
  0x10   :  { %78 = vmatpush.msra.mxu0 %v56_v2 }
  0x12   :  { %79 = vmatpush.msra.mxu0 %v55_v3 }
  0x13   :  { %104 = vmatmul.msk.f32.vlgmr.msra.gmra.mxu0 %vm60_vm0, %v54_v4 }
  0x90   :  { %v81_v6 = vpop.f32.mrf.mxu0 }
  0x91   :  { %v84_v7 = vadd.f32 %v110_v5, %v81_v6 }
  0x93   :  { %85 = vst [vmem:[#allocation7] sm:$0xff] %v84_v7 }
  0x94   :  { %96 = dma.vmem_to_hbm [thread:$0]  %s92_s25, 128, %s94_s28, [#allocation4]  }
  0x95   :  { %187 = dma.done.wait [#allocation4], 128  }
  0x96   :  { %188 = vsyncadd [#allocation4], 4294967168 }
  0x97   :  { %101 = vsyncpa [#allocation3], 1 }
  0x98   :  { %102 = vsyncpa [#allocation6], 1 }
  0x99   :  { %103 = vsyncpa [#allocation4], 1 }

</bundles_post_ra>
